<compile_context>
chip_gen: v5e
topology: v5e:2x2
jax: 0.10.0
libtpu: 0.0.40
codegen_flags: <defaults>
</compile_context>

<pallas_src>
import functools

import jax
import jax.numpy as jnp
from jax.experimental import pallas as pl
from jax.experimental.pallas import tpu as pltpu


def _round_up(a: int, b: int) -> int:
    return ((a + b - 1) // b) * b


def _autoencoder_kernel(
    x_ref,
    w1_ref, b1_ref,
    w2_ref, b2_ref,
    w3_ref, b3_ref,
    w4_ref, b4_ref,
    o_ref,
):
    """Fused forward pass for one batch tile. Everything lives in VMEM."""
    mxu_dtype = w1_ref.dtype  # MXU feed dtype (bf16 by default, f32 optional)

    # Cast the activation tile to the MXU feed dtype *inside* the kernel: this
    # is free VALU work hidden under the tile DMA and avoids a separate,
    # un-fused HBM-round-trip cast op in the wrapper.
    x = x_ref[...].astype(mxu_dtype)

    # encoder: Linear(D,128) + ReLU   (f32 accumulation, f32 bias/activation)
    h = jnp.dot(x, w1_ref[...], preferred_element_type=jnp.float32) + b1_ref[...]
    h = jnp.maximum(h, 0.0)

    # encoder: Linear(128,64) + ReLU
    h = jnp.dot(h.astype(mxu_dtype), w2_ref[...],
                preferred_element_type=jnp.float32) + b2_ref[...]
    h = jnp.maximum(h, 0.0)

    # decoder: Linear(64,128) + ReLU
    h = jnp.dot(h.astype(mxu_dtype), w3_ref[...],
                preferred_element_type=jnp.float32) + b3_ref[...]
    h = jnp.maximum(h, 0.0)

    # decoder: Linear(128,D) + Sigmoid
    h = jnp.dot(h.astype(mxu_dtype), w4_ref[...],
                preferred_element_type=jnp.float32) + b4_ref[...]

    # Numerically-safe sigmoid on the EUP: clamp so exp never overflows
    # (sigmoid(h) < 1e-13 for h < -30, indistinguishable at our tolerances),
    # then exp + approx reciprocal — both EUP slots, off the VALU path.
    z = jnp.exp(-jnp.maximum(h, -30.0))
    o_ref[...] = pl.reciprocal(1.0 + z, approx=True).astype(o_ref.dtype)


@functools.partial(jax.jit, static_argnames=("tile_b", "mxu_bf16", "out_dtype"))
def autoencoder_forward(x, params, *, tile_b=1024, mxu_bf16=True, out_dtype=None):
    """Fused autoencoder forward.

    x:        (B, D) activations (f32 or bf16 — dtype is kept at the HBM
              boundary; the MXU-feed cast happens inside the kernel).
    params:   dict from init_params (weights stored (in, out), biases (1, out)).
    tile_b:   target batch tile (main perf knob; 512-2048 is the sweet spot).
              The effective tile is balanced across grid steps, sublane-aligned
              and capped by a ~24 MiB VMEM budget; arbitrary B works with at
              most a few wasted (discarded) rows in the last grid step.
    mxu_bf16: feed the MXU in bf16 on all generations (f32 accumulation and
              f32 elementwise kept inside the kernel). ~1e-2 abs error vs f32.
    out_dtype: output dtype; bf16 halves store-side HBM traffic (kernel is
              HBM-bound, so this is ~25-33% wall-clock on v6e/v7x).
    """
    B, D = x.shape
    orig_B, orig_D = B, D
    out_dtype = jnp.dtype(x.dtype if out_dtype is None else out_dtype)

    # ---- lane-align the feature dimension to a multiple of 128 --------------
    # (lane-dense output stores are the single biggest measured lever; avoids
    #  masked vst.msk stores and masked x loads).
    Dp = _round_up(D, 128)
    w1, w4, b4 = params["w1"], params["w4"], params["b4"]
    if Dp != D:
        x = jnp.pad(x, ((0, 0), (0, Dp - D)))
        w1 = jnp.pad(w1, ((0, Dp - D), (0, 0)))
        w4 = jnp.pad(w4, ((0, 0), (0, Dp - D)))
        b4 = jnp.pad(b4, ((0, 0), (0, Dp - D)))

    # ---- dtypes: weights in MXU feed dtype, biases f32 ----------------------
    mxu_dtype = jnp.bfloat16 if mxu_bf16 else x.dtype
    w1 = w1.astype(mxu_dtype)
    w2 = params["w2"].astype(mxu_dtype)
    w3 = params["w3"].astype(mxu_dtype)
    w4 = w4.astype(mxu_dtype)
    b1 = params["b1"].astype(jnp.float32)
    b2 = params["b2"].astype(jnp.float32)
    b3 = params["b3"].astype(jnp.float32)
    b4 = b4.astype(jnp.float32)
    weights = (w1, b1, w2, b2, w3, b3, w4, b4)
    weight_bytes = sum(a.size * a.dtype.itemsize for a in weights)

    # ---- batch tiling --------------------------------------------------------
    # Sublane packing: 16 rows/vreg for 16-bit HBM I/O, 8 for f32.
    align = 16 if min(x.dtype.itemsize, out_dtype.itemsize) < 4 else 8
    if B < align:  # a block may never be larger than the array along batch
        x = jnp.pad(x, ((0, align - B), (0, 0)))
        B = align

    tile = max(align, _round_up(tile_b, align))
    n = pl.cdiv(B, tile)
    if B >= 2 * align:
        # Grid length >= 2 and even so the "parallel" axis shards evenly
        # across both v7x TensorCores; costs <1us extra on 1-TC v5e/v6e.
        n = max(n, 2)
        n += n % 2
    tb = _round_up(pl.cdiv(B, n), align)              # balanced tile: minimal waste
    tb = min(tb, max(align, (B // align) * align))    # never exceed the array dim

    # VMEM cap: double-buffered x/out tiles + weights + f32 intermediates must
    # stay under ~24 MiB so the kernel fits the 32 MiB scoped default on every
    # generation (v7x has only 64 MiB physical VMEM).
    per_row = (Dp * (2 * x.dtype.itemsize + 2 * out_dtype.itemsize + 4 + 2)
               + 2 * 4 * (128 + 64 + 128))
    budget = 24 * 1024 * 1024 - 2 * weight_bytes
    tb = min(tb, max(align, (max(budget, 0) // per_row) // align * align))

    # Last block may be partial; Pallas bounds the DMAs and drops out-of-range
    # output rows (rows are independent, so over-read rows are harmless).
    grid_n = pl.cdiv(B, tb)

    def full_spec(shape):
        # Weights/biases are small (<0.5 MB) and use a constant block index,
        # so they are fetched once and stay resident across grid steps.
        # TODO(synk): pipeline_mode=pl.Buffered(1) here would drop the unused
        # second buffer (~0.4 MB VMEM); left at the default for lowering
        # portability across jax versions.
        return pl.BlockSpec(shape, lambda i: (0,) * len(shape))

    # Advisory cost hint for XLA scheduling around the custom call.
    flops = 2 * grid_n * tb * (Dp * 128 + 128 * 64 + 64 * 128 + 128 * Dp)
    bytes_accessed = (orig_B * Dp * x.dtype.itemsize
                      + orig_B * Dp * out_dtype.itemsize
                      + weight_bytes)

    out = pl.pallas_call(
        _autoencoder_kernel,
        out_shape=jax.ShapeDtypeStruct((B, Dp), out_dtype),
        grid_spec=pltpu.PrefetchScalarGridSpec(
            num_scalar_prefetch=0,
            grid=(grid_n,),
            in_specs=[
                pl.BlockSpec((tb, Dp), lambda i: (i, 0)),  # x tile
                full_spec(w1.shape), full_spec(b1.shape),
                full_spec(w2.shape), full_spec(b2.shape),
                full_spec(w3.shape), full_spec(b3.shape),
                full_spec(w4.shape), full_spec(b4.shape),
            ],
            out_specs=pl.BlockSpec((tb, Dp), lambda i: (i, 0)),
        ),
        compiler_params=pltpu.CompilerParams(
            dimension_semantics=("parallel",),
        ),
        cost_estimate=pl.CostEstimate(
            flops=flops,
            transcendentals=grid_n * tb * Dp,
            bytes_accessed=bytes_accessed,
        ),
    )(x, *weights)

    if (B, Dp) != (orig_B, orig_D):
        out = out[:orig_B, :orig_D]
    return out


def init_params(key, input_size):
    """Deterministic init mirroring nn.Linear shapes.
    Stored as (in_features, out_features) so the kernel does x @ W + b.
    Uses PyTorch-style uniform(-1/sqrt(fan_in), 1/sqrt(fan_in)) bounds."""
    dims = [(input_size, 128), (128, 64), (64, 128), (128, input_size)]
    params = {}
    for idx, (fan_in, fan_out) in enumerate(dims, start=1):
        key, kw, kb = jax.random.split(key, 3)
        bound = 1.0 / jnp.sqrt(jnp.float32(fan_in))
        params[f"w{idx}"] = jax.random.uniform(
            kw, (fan_in, fan_out), jnp.float32, -bound, bound
        )
        # bias kept 2D (1, fan_out) for clean TPU layout / broadcasting
        params[f"b{idx}"] = jax.random.uniform(
            kb, (1, fan_out), jnp.float32, -bound, bound
        )
    return params


def _reference_forward(x, params):
    """Plain-JAX reference for correctness checking."""
    h = jnp.maximum(x @ params["w1"] + params["b1"], 0.0)
    h = jnp.maximum(h @ params["w2"] + params["b2"], 0.0)
    h = jnp.maximum(h @ params["w3"] + params["b3"], 0.0)
    return jax.nn.sigmoid(h @ params["w4"] + params["b4"])


if __name__ == "__main__":
    INPUT_SIZE = 256   # model feature dimension D (lane-aligned)
    BATCH = 12         # deliberately not a multiple of 8 -> partial last block

    key = jax.random.PRNGKey(0)
    key, kx = jax.random.split(key)
    x = jax.random.normal(kx, (BATCH, INPUT_SIZE), jnp.float32)

    params = init_params(key, INPUT_SIZE)
    ref = _reference_forward(x, params)

    # Default path: bf16 MXU feed, f32 HBM I/O.
    out = jax.block_until_ready(autoencoder_forward(x, params))
    assert out.shape == (BATCH, INPUT_SIZE)
    assert jnp.allclose(out, ref, atol=3e-2, rtol=3e-2), "bf16-feed mismatch"

    # Pure f32 path, tight tolerance.
    out_f32 = jax.block_until_ready(autoencoder_forward(x, params, mxu_bf16=False))
    assert jnp.allclose(out_f32, ref, atol=2e-3, rtol=2e-3), "f32 mismatch"

    # bf16-output path (halves store-side HBM traffic).
    out_bf16 = jax.block_until_ready(
        autoencoder_forward(x, params, out_dtype=jnp.bfloat16))
    assert out_bf16.dtype == jnp.bfloat16
    assert jnp.allclose(out_bf16.astype(jnp.float32), ref,
                        atol=5e-2, rtol=5e-2), "bf16-out mismatch"

    # Non-lane-aligned feature dim -> padded to a 128 multiple in the wrapper.
    D2, B2 = 200, 10
    key, kx2, kp2 = jax.random.split(key, 3)
    x2 = jax.random.normal(kx2, (B2, D2), jnp.float32)
    params2 = init_params(kp2, D2)
    ref2 = _reference_forward(x2, params2)
    out2 = jax.block_until_ready(autoencoder_forward(x2, params2))
    assert out2.shape == (B2, D2)
    assert jnp.allclose(out2, ref2, atol=4e-2, rtol=4e-2), "padded-D mismatch"

    print("KERNEL_OK")
</pallas_src>

<mosaic_0001>
module attributes {stable_mosaic.version = 11 : i64} {
  func.func @_autoencoder_kernel(%arg0: i32, %arg1: memref<8x256xf32, #tpu.memory_space<vmem>>, %arg2: memref<256x128xbf16, #tpu.memory_space<vmem>>, %arg3: memref<1x128xf32, #tpu.memory_space<vmem>>, %arg4: memref<128x64xbf16, #tpu.memory_space<vmem>>, %arg5: memref<1x64xf32, #tpu.memory_space<vmem>>, %arg6: memref<64x128xbf16, #tpu.memory_space<vmem>>, %arg7: memref<1x128xf32, #tpu.memory_space<vmem>>, %arg8: memref<128x256xbf16, #tpu.memory_space<vmem>>, %arg9: memref<1x256xf32, #tpu.memory_space<vmem>>, %arg10: memref<8x256xf32, #tpu.memory_space<vmem>>) attributes {dimension_semantics = [#tpu.dimension_semantics<parallel>], iteration_bounds = array<i64: 2>, scalar_prefetch = 0 : i64, scratch_operands = 0 : i64, tpu.core_type = #tpu.core_type<tc>, window_params = [{transform_indices = @transform_0, window_bounds = array<i64: 8, 256>}, {pipeline_mode = #tpu.pipeline_mode<synchronous>, transform_indices = @transform_1, window_bounds = array<i64: 256, 128>}, {pipeline_mode = #tpu.pipeline_mode<synchronous>, transform_indices = @transform_2, window_bounds = array<i64: 1, 128>}, {pipeline_mode = #tpu.pipeline_mode<synchronous>, transform_indices = @transform_3, window_bounds = array<i64: 128, 64>}, {pipeline_mode = #tpu.pipeline_mode<synchronous>, transform_indices = @transform_4, window_bounds = array<i64: 1, 64>}, {pipeline_mode = #tpu.pipeline_mode<synchronous>, transform_indices = @transform_5, window_bounds = array<i64: 64, 128>}, {pipeline_mode = #tpu.pipeline_mode<synchronous>, transform_indices = @transform_6, window_bounds = array<i64: 1, 128>}, {pipeline_mode = #tpu.pipeline_mode<synchronous>, transform_indices = @transform_7, window_bounds = array<i64: 128, 256>}, {pipeline_mode = #tpu.pipeline_mode<synchronous>, transform_indices = @transform_8, window_bounds = array<i64: 1, 256>}, {transform_indices = @transform_9, window_bounds = array<i64: 8, 256>}]} {
    %c0 = arith.constant 0 : index
    %c0_0 = arith.constant 0 : index
    %0 = vector.load %arg1[%c0, %c0_0] : memref<8x256xf32, #tpu.memory_space<vmem>>, vector<8x256xf32>
    %1 = arith.truncf %0 : vector<8x256xf32> to vector<8x256xbf16>
    %c0_1 = arith.constant 0 : index
    %c0_2 = arith.constant 0 : index
    %2 = vector.load %arg2[%c0_1, %c0_2] : memref<256x128xbf16, #tpu.memory_space<vmem>>, vector<256x128xbf16>
    %cst = arith.constant dense<0.000000e+00> : vector<8x128xf32>
    %3 = tpu.matmul %1, %2, %cst {dimension_numbers = #tpu.dot_dimension_numbers<[1], [0], [0], [1], [0, 0, 1, 1], [], []>} : vector<8x256xbf16>, vector<256x128xbf16>, vector<8x128xf32> -> vector<8x128xf32>
    %c0_3 = arith.constant 0 : index
    %c0_4 = arith.constant 0 : index
    %4 = vector.load %arg3[%c0_3, %c0_4] : memref<1x128xf32, #tpu.memory_space<vmem>>, vector<1x128xf32>
    %5 = vector.broadcast %4 : vector<1x128xf32> to vector<8x128xf32>
    %6 = arith.addf %3, %5 : vector<8x128xf32>
    %cst_5 = arith.constant 0.000000e+00 : f32
    %7 = vector.broadcast %cst_5 : f32 to vector<8x128xf32>
    %8 = arith.maximumf %6, %7 : vector<8x128xf32>
    %9 = arith.truncf %8 : vector<8x128xf32> to vector<8x128xbf16>
    %c0_6 = arith.constant 0 : index
    %c0_7 = arith.constant 0 : index
    %10 = vector.load %arg4[%c0_6, %c0_7] : memref<128x64xbf16, #tpu.memory_space<vmem>>, vector<128x64xbf16>
    %cst_8 = arith.constant dense<0.000000e+00> : vector<8x64xf32>
    %11 = tpu.matmul %9, %10, %cst_8 {dimension_numbers = #tpu.dot_dimension_numbers<[1], [0], [0], [1], [0, 0, 1, 1], [], []>} : vector<8x128xbf16>, vector<128x64xbf16>, vector<8x64xf32> -> vector<8x64xf32>
    %c0_9 = arith.constant 0 : index
    %c0_10 = arith.constant 0 : index
    %12 = vector.load %arg5[%c0_9, %c0_10] : memref<1x64xf32, #tpu.memory_space<vmem>>, vector<1x64xf32>
    %13 = vector.broadcast %12 : vector<1x64xf32> to vector<8x64xf32>
    %14 = arith.addf %11, %13 : vector<8x64xf32>
    %cst_11 = arith.constant 0.000000e+00 : f32
    %15 = vector.broadcast %cst_11 : f32 to vector<8x64xf32>
    %16 = arith.maximumf %14, %15 : vector<8x64xf32>
    %17 = arith.truncf %16 : vector<8x64xf32> to vector<8x64xbf16>
    %c0_12 = arith.constant 0 : index
    %c0_13 = arith.constant 0 : index
    %18 = vector.load %arg6[%c0_12, %c0_13] : memref<64x128xbf16, #tpu.memory_space<vmem>>, vector<64x128xbf16>
    %cst_14 = arith.constant dense<0.000000e+00> : vector<8x128xf32>
    %19 = tpu.matmul %17, %18, %cst_14 {dimension_numbers = #tpu.dot_dimension_numbers<[1], [0], [0], [1], [0, 0, 1, 1], [], []>} : vector<8x64xbf16>, vector<64x128xbf16>, vector<8x128xf32> -> vector<8x128xf32>
    %c0_15 = arith.constant 0 : index
    %c0_16 = arith.constant 0 : index
    %20 = vector.load %arg7[%c0_15, %c0_16] : memref<1x128xf32, #tpu.memory_space<vmem>>, vector<1x128xf32>
    %21 = vector.broadcast %20 : vector<1x128xf32> to vector<8x128xf32>
    %22 = arith.addf %19, %21 : vector<8x128xf32>
    %cst_17 = arith.constant 0.000000e+00 : f32
    %23 = vector.broadcast %cst_17 : f32 to vector<8x128xf32>
    %24 = arith.maximumf %22, %23 : vector<8x128xf32>
    %25 = arith.truncf %24 : vector<8x128xf32> to vector<8x128xbf16>
    %c0_18 = arith.constant 0 : index
    %c0_19 = arith.constant 0 : index
    %26 = vector.load %arg8[%c0_18, %c0_19] : memref<128x256xbf16, #tpu.memory_space<vmem>>, vector<128x256xbf16>
    %cst_20 = arith.constant dense<0.000000e+00> : vector<8x256xf32>
    %27 = tpu.matmul %25, %26, %cst_20 {dimension_numbers = #tpu.dot_dimension_numbers<[1], [0], [0], [1], [0, 0, 1, 1], [], []>} : vector<8x128xbf16>, vector<128x256xbf16>, vector<8x256xf32> -> vector<8x256xf32>
    %c0_21 = arith.constant 0 : index
    %c0_22 = arith.constant 0 : index
    %28 = vector.load %arg9[%c0_21, %c0_22] : memref<1x256xf32, #tpu.memory_space<vmem>>, vector<1x256xf32>
    %29 = vector.broadcast %28 : vector<1x256xf32> to vector<8x256xf32>
    %30 = arith.addf %27, %29 : vector<8x256xf32>
    %cst_23 = arith.constant -3.000000e+01 : f32
    %31 = vector.broadcast %cst_23 : f32 to vector<8x256xf32>
    %32 = arith.maximumf %30, %31 : vector<8x256xf32>
    %cst_24 = arith.constant 0.000000e+00 : f32
    %33 = vector.broadcast %cst_24 : f32 to vector<8x256xf32>
    %34 = arith.subf %33, %32 : vector<8x256xf32>
    %35 = math.exp %34 : vector<8x256xf32>
    %cst_25 = arith.constant 1.000000e+00 : f32
    %36 = vector.broadcast %cst_25 : f32 to vector<8x256xf32>
    %37 = arith.addf %36, %35 : vector<8x256xf32>
    %38 = tpu.reciprocal %37 {approx = true} : vector<8x256xf32> -> vector<8x256xf32>
    %c0_26 = arith.constant 0 : index
    %c0_27 = arith.constant 0 : index
    %39 = vector.load %arg10[%c0_26, %c0_27] : memref<8x256xf32, #tpu.memory_space<vmem>>, vector<8x256xf32>
    tpu.vector_store %arg10[%c0_26, %c0_27], %38 {strides = array<i32>} : memref<8x256xf32, #tpu.memory_space<vmem>>, vector<8x256xf32>,
    return
  }
  func.func @transform_0(%arg0: i32) -> (i32, i32) {
    %c0_i32 = arith.constant 0 : i32
    %c0_i32_0 = arith.constant 0 : i32
    return %arg0, %c0_i32 : i32, i32
  }
  func.func @transform_1(%arg0: i32) -> (i32, i32) {
    %c0_i32 = arith.constant 0 : i32
    %c0_i32_0 = arith.constant 0 : i32
    %c0_i32_1 = arith.constant 0 : i32
    return %c0_i32, %c0_i32_0 : i32, i32
  }
  func.func @transform_2(%arg0: i32) -> (i32, i32) {
    %c0_i32 = arith.constant 0 : i32
    %c0_i32_0 = arith.constant 0 : i32
    %c0_i32_1 = arith.constant 0 : i32
    return %c0_i32, %c0_i32_0 : i32, i32
  }
  func.func @transform_3(%arg0: i32) -> (i32, i32) {
    %c0_i32 = arith.constant 0 : i32
    %c0_i32_0 = arith.constant 0 : i32
    %c0_i32_1 = arith.constant 0 : i32
    return %c0_i32, %c0_i32_0 : i32, i32
  }
  func.func @transform_4(%arg0: i32) -> (i32, i32) {
    %c0_i32 = arith.constant 0 : i32
    %c0_i32_0 = arith.constant 0 : i32
    %c0_i32_1 = arith.constant 0 : i32
    return %c0_i32, %c0_i32_0 : i32, i32
  }
  func.func @transform_5(%arg0: i32) -> (i32, i32) {
    %c0_i32 = arith.constant 0 : i32
    %c0_i32_0 = arith.constant 0 : i32
    %c0_i32_1 = arith.constant 0 : i32
    return %c0_i32, %c0_i32_0 : i32, i32
  }
  func.func @transform_6(%arg0: i32) -> (i32, i32) {
    %c0_i32 = arith.constant 0 : i32
    %c0_i32_0 = arith.constant 0 : i32
    %c0_i32_1 = arith.constant 0 : i32
    return %c0_i32, %c0_i32_0 : i32, i32
  }
  func.func @transform_7(%arg0: i32) -> (i32, i32) {
    %c0_i32 = arith.constant 0 : i32
    %c0_i32_0 = arith.constant 0 : i32
    %c0_i32_1 = arith.constant 0 : i32
    return %c0_i32, %c0_i32_0 : i32, i32
  }
  func.func @transform_8(%arg0: i32) -> (i32, i32) {
    %c0_i32 = arith.constant 0 : i32
    %c0_i32_0 = arith.constant 0 : i32
    %c0_i32_1 = arith.constant 0 : i32
    return %c0_i32, %c0_i32_0 : i32, i32
  }
  func.func @transform_9(%arg0: i32) -> (i32, i32) {
    %c0_i32 = arith.constant 0 : i32
    %c0_i32_0 = arith.constant 0 : i32
    return %arg0, %c0_i32 : i32, i32
  }
}

</mosaic_0001>

<bundles_post_ra>
// kernel: autoencoder_forward.1
= control target key start
LH: loop header
LB: loop body
LE: loop exit
PB: predicated region body
PF: predicated region fallthrough
CT: control target
= control target key end

     0   :  { %14 = vsyncpa [#allocation3], 0  ;;  %s1528_s0 = inlined_call_operand.vmem [shape: f32[12,256], index: 0, kind: input, shape index: {}]   ;;  %s1529_s1 = inlined_call_operand.vmem [shape: bf16[256,128], index: 1, kind: input, shape index: {}]   ;;  %s1530_s2 = inlined_call_operand.vmem [shape: f32[1,128], index: 2, kind: input, shape index: {}]   ;;  %s1531_s3 = inlined_call_operand.vmem [shape: bf16[128,64], index: 3, kind: input, shape index: {}]   ;;  %s1532_s4 = inlined_call_operand.vmem [shape: f32[1,64], index: 4, kind: input, shape index: {}]   ;;  %s1533_s5 = inlined_call_operand.vmem [shape: bf16[64,128], index: 5, kind: input, shape index: {}]   ;;  %s1534_s6 = inlined_call_operand.vmem [shape: f32[1,128], index: 6, kind: input, shape index: {}]   ;;  %s1535_s7 = inlined_call_operand.vmem [shape: bf16[128,256], index: 7, kind: input, shape index: {}]   ;;  %s1536_s8 = inlined_call_operand.vmem [shape: f32[1,256], index: 8, kind: input, shape index: {}]   ;;  %s1537_s9 = inlined_call_operand.hbm [shape: f32[12,256], index: 9, kind: output, shape index: {}]  }
   0x1   :  { %16 = vsyncpa [#allocation3 + $0x1], 0  ;;  %s1251_s30 = smov 0   ;;  %s1253_s10 = smov 0  }
   0x2   :  { %s1255_s11 = smov 0   ;;  %s1257_s12 = smov 0  }
   0x3 LB: > { %s1272_s13 = sadd.s32 4294967295, %s1199_s12   ;;  %s852_s14 = sadd.s32 4294967294, %s1199_s12   ;;  %s1199_s12 = sphi %s1257_s12, %s1545_s12   ;;  %s1195_s11 = sphi %s1255_s11, %s1544_s11   ;;  %s1191_s10 = sphi %s1253_s10, %s1543_s10   ;;  %s1187_s30 = sphi %s1251_s30, %s1542_s30  }
   0x4   : > { %s1276_s15 = sadd.s32 1, %s1199_s12   ;;  %s223_s16 = sadd.s32 1, %s1195_s11 }
   0x5   : > { %s220_s17 = ssub.s32 %s1199_s12, %s1276_s15  ;;  %p233_p0 = scmp.ne.s32.totalorder %s1195_s11, %s1191_s10 }
   0x6   : > { %p221_p1 = scmp.eq.s32.totalorder %s220_s17, 0  ;;  %p234_p2 = scmp.eq.s32.totalorder %s1272_s13, 1 }
   0x7   : > { %p239_p3 = scmp.ne.s32.totalorder %s1191_s10, %s1187_s30  ;;  %p240_p4 = scmp.eq.s32.totalorder %s852_s14, 1 }
   0x8   : > { %s1287_s18 = scalar_select %p221_p1, %s1195_s11, %s223_s16  }
   0x9   : > { %p1289_p5 = por %p234_p2, %p233_p0  ;;  %p1293_p6 = por %p240_p4, %p239_p3 }
   0xa   : > { %1538 = sst [smem:[#allocation5_spill]] %s1287_s18  ;;  %p855_p7 = scmp.ge.s32.totalorder %s1199_s12, 1 }
   0xb   : > { %p290_p8 = scmp.lt.s32.totalorder %s1199_s12, 3 }
   0xd   : > { %p291_p9 = pnand %p855_p7, %p290_p8 }
   0xe   : > { %p326_p10 = scmp.lt.s32.totalorder (!%p291_p9), %s1272_s13, 1  ;;  %s323_s27 = sand.u32 (!%p291_p9), 1, %s1191_s10  }
   0xf   : > { %294 = sbr.rel (%p291_p9) target bundleno = 621 (0x26d), region = 56  ;;  %s1086_s29 = sshll.u32 (!%p291_p9), %s1272_s13, 4 }
  0x10   : > { %s788_s16 = scalar_lea.hbm (!%p291_p9), %s1537_s9, %s1086_s29  ;;  %s777_s22 = scalar_lea.sflag (!%p291_p9), [#allocation3], %s323_s27 }
  0x11   : > { %s1157_s29 = scalar_lea.hbm (!%p291_p9), %s1537_s9, 32 }
  0x14   : > { %v1049_v0 = vld [vmem:[%s1529_s1 + $0x38] sm:$0xff]  ;;  %v1048_v2 = vld [vmem:[%s1529_s1 + $0x30] sm:$0xff]  ;;  %v1047_v5 = vld [vmem:[%s1529_s1 + $0x28] sm:$0xff]  ;;  %s327_s25 = scalar_select %p326_p10, %s1272_s13, 1  ;;  %vm615_vm0 = vcmask 523264  }
  0x15   : > { %v1057_v1 = vld [vmem:[%s1529_s1 + $0x78] sm:$0xff]  ;;  %468 = vmatpush.bf16.msra.mxu0 %v1049_v0  ;;  %v1056_v3 = vld [vmem:[%s1529_s1 + $0x70] sm:$0xff]  ;;  %v1055_v6 = vld [vmem:[%s1529_s1 + $0x68] sm:$0xff] }
  0x16   : > { %481 = vmatpush.bf16.msra.mxu1 %v1057_v1  ;;  %v1065_v4 = vld [vmem:[%s1531_s3 + $0x38] sm:$0xff]  ;;  %v1064_v7 = vld [vmem:[%s1531_s3 + $0x30] sm:$0xff]  ;;  %v1046_v8 = vld [vmem:[%s1529_s1 + $0x20] sm:$0xff]  ;;  %s1041_s17 = sshll.u32 %s327_s25, 4 }
  0x17   : > { %564 = vmatpush.bf16.msra.mxu2 %v1065_v4  ;;  %v1054_v9 = vld [vmem:[%s1529_s1 + $0x60] sm:$0xff]  ;;  %v1063_v10 = vld [vmem:[%s1531_s3 + $0x28] sm:$0xff]  ;;  %v1045_v11 = vld [vmem:[%s1529_s1 + $0x18] sm:$0xff]  ;;  %s330_s28 = scalar_lea.vmem %s1528_s0, %s1041_s17  ;;  %s792_s17 = sshll.u32 %s788_s16, 4  ;;  %s793_s17 = int_to_ptr.hbm [resolvable:$true] %s792_s17 }
  0x18   : > { %v1053_v12 = vld [vmem:[%s1529_s1 + $0x58] sm:$0xff]  ;;  %v1062_v13 = vld [vmem:[%s1531_s3 + $0x20] sm:$0xff]  ;;  %v1044_v14 = vld [vmem:[%s1529_s1 + $0x10] sm:$0xff]  ;;  %s1151_s23 = sshra.s32 %s793_s17, 4  ;;  %s1152_s23 = int_to_ptr.hbm [resolvable:$true] %s1151_s23 }
  0x19   : > { %469 = vmatpush.bf16.msra.mxu0 %v1048_v2  ;;  %v1052_v15 = vld [vmem:[%s1529_s1 + $0x50] sm:$0xff]  ;;  %v1061_v16 = vld [vmem:[%s1531_s3 + $0x18] sm:$0xff]  ;;  %v1043_v17 = vld [vmem:[%s1529_s1 + $0x8] sm:$0xff]  ;;  %s1153_s13 = scalar_lea.hbm %s1152_s23, 16  ;;  %p1158_p0 = scmp.lt.s32.totalorder %s1152_s23, %s1537_s9 }
  0x1a   : > { %482 = vmatpush.bf16.msra.mxu1 %v1056_v3  ;;  %v1051_v18 = vld [vmem:[%s1529_s1 + $0x48] sm:$0xff]  ;;  %v1060_v19 = vld [vmem:[%s1531_s3 + $0x10] sm:$0xff]  ;;  %v1042_v20 = vld [vmem:[%s1529_s1] sm:$0xff]  ;;  %p1154_p11 = scmp.ne.s32.totalorder %s1152_s23, %s1153_s13  ;;  %p1159_p1 = scmp.lt.s32.totalorder %s1157_s29, %s1153_s13 }
  0x1b   : > { %565 = vmatpush.bf16.msra.mxu2 %v1064_v7  ;;  %v1050_v21 = vld [vmem:[%s1529_s1 + $0x40] sm:$0xff]  ;;  %v333_v23 = vld [vmem:[%s330_s28 + $0x8] sm:$0xff]  ;;  %v1069_v28 = vld [vmem:[%s1533_s5 + $0x18] sm:$0xff] }
  0x1c   : > { %v332_v22 = vld [vmem:[%s330_s28] sm:$0xff]  ;;  %v335_v25 = vpack.c.bf16 %v333_v23, %v333_v23  ;;  %v1059_v26 = vld [vmem:[%s1531_s3 + $0x8] sm:$0xff]  ;;  %623 = vmatpush.bf16.msra.mxu3 %v1069_v28  ;;  %v1068_v29 = vld [vmem:[%s1533_s5 + $0x10] sm:$0xff]  ;;  %s856_s28 = sshll.u32 %s323_s27, 4  ;;  %p1155_p12 = pnand %p1154_p11, %p1289_p5 }
  0x1d   : > { %470 = vmatpush.bf16.msra.mxu0 %v1047_v5  ;;  %v334_v24 = vpack.c.bf16 %v332_v22, %v332_v22  ;;  %v1058_v27 = vld [vmem:[%s1531_s3] sm:$0xff]  ;;  %v1067_v39 = vld [vmem:[%s1533_s5 + $0x8] sm:$0xff]  ;;  %v1030_v41 = vld [vmem:[%s1535_s7 + $0x70] sm:$0xf]  ;;  %s325_s21 = scalar_lea.vmem [#allocation2], %s856_s28  ;;  %p1160_p2 = por %p1159_p1, %p1158_p0 }
  0x1e   : > { %483 = vmatpush.bf16.msra.mxu1 %v1055_v6  ;;  %v1126_v30 = vld [vmem:[%s1530_s2] ss:$0 sm:$0xff]  ;;  %v1085_v42 = vld [vmem:[%s1535_s7 + $0x74] sm:$0xf0]  ;;  %v1084_v43 = vld [vmem:[%s1535_s7 + $0x74] sm:$0xf]  ;;  %p1156_p13 = pneg %p1155_p12 }
  0x1f   : > { %566 = vmatpush.bf16.msra.mxu2 %v1063_v10  ;;  %v1066_v40 = vld [vmem:[%s1533_s5] sm:$0xff]  ;;  %v1031_v44 = vor.u32 %v1085_v42, %v1030_v41  ;;  %v1032_v45 = vld [vmem:[%s1535_s7 + $0x78] sm:$0xf0]  ;;  %v1083_v47 = vld [vmem:[%s1535_s7 + $0x64] sm:$0xf0]  ;;  %s790_s18 = sshll.u32 %s325_s21, 4  ;;  %s791_s18 = int_to_ptr.vmem [resolvable:$true] %s790_s18 }
  0x20   : > { %624 = vmatpush.bf16.msra.mxu3 %v1068_v29  ;;  %v1022_v46 = vld [vmem:[%s1535_s7 + $0x60] sm:$0xf]  ;;  %v1035_v48 = vor.u32 %v1084_v43, %v1032_v45  ;;  %v1082_v49 = vld [vmem:[%s1535_s7 + $0x64] sm:$0xf]  ;;  %v1024_v50 = vld [vmem:[%s1535_s7 + $0x68] sm:$0xf0]  ;;  %p1161_p3 = pnand %p1160_p2, %p1156_p13 }
  0x21   : > { %471 = vmatpush.bf16.msra.mxu0 %v1046_v8  ;;  %v1023_v51 = vor.u32 %v1083_v47, %v1022_v46  ;;  %v1027_v52 = vor.u32 %v1082_v49, %v1024_v50  ;;  %v1014_v53 = vld [vmem:[%s1535_s7 + $0x50] sm:$0xf]  ;;  %v1081_v54 = vld [vmem:[%s1535_s7 + $0x54] sm:$0xf0]  ;;  %v1080_v55 = vld [vmem:[%s1535_s7 + $0x54] sm:$0xf] }
  0x22   : > { %484 = vmatpush.bf16.msra.mxu1 %v1054_v9  ;;  %v1016_v56 = vld [vmem:[%s1535_s7 + $0x58] sm:$0xf0]  ;;  %v1015_v57 = vor.u32 %v1081_v54, %v1014_v53  ;;  %v1006_v59 = vld [vmem:[%s1535_s7 + $0x40] sm:$0xf]  ;;  %v1079_v60 = vld [vmem:[%s1535_s7 + $0x44] sm:$0xf0] }
  0x23   : > { %567 = vmatpush.bf16.msra.mxu2 %v1062_v13  ;;  %v1019_v58 = vor.u32 %v1080_v55, %v1016_v56  ;;  %v1078_v61 = vld [vmem:[%s1535_s7 + $0x44] sm:$0xf]  ;;  %v1008_v62 = vld [vmem:[%s1535_s7 + $0x48] sm:$0xf0]  ;;  %v1007_v63 = vor.u32 %v1079_v60, %v1006_v59  ;;  %v998_v1 = vld [vmem:[%s1535_s7 + $0x30] sm:$0xf] }
  0x24   : > { %625 = vmatpush.bf16.msra.mxu3 %v1067_v39  ;;  %v1011_v0 = vor.u32 %v1078_v61, %v1008_v62  ;;  %v1077_v2 = vld [vmem:[%s1535_s7 + $0x34] sm:$0xf0]  ;;  %v1076_v3 = vld [vmem:[%s1535_s7 + $0x34] sm:$0xf]  ;;  %v1000_v4 = vld [vmem:[%s1535_s7 + $0x38] sm:$0xf0] }
  0x25   : > { %472 = vmatpush.bf16.msra.mxu0 %v1045_v11  ;;  %v999_v5 = vor.u32 %v1077_v2, %v998_v1  ;;  %v1003_v6 = vor.u32 %v1076_v3, %v1000_v4  ;;  %v990_v7 = vld [vmem:[%s1535_s7 + $0x20] sm:$0xf]  ;;  %v1075_v8 = vld [vmem:[%s1535_s7 + $0x24] sm:$0xf0]  ;;  %v1074_v9 = vld [vmem:[%s1535_s7 + $0x24] sm:$0xf] }
  0x26   : > { %485 = vmatpush.bf16.msra.mxu1 %v1053_v12  ;;  %v992_v10 = vld [vmem:[%s1535_s7 + $0x28] sm:$0xf0]  ;;  %v991_v11 = vor.u32 %v1075_v8, %v990_v7  ;;  %v1127_v13 = vld [vmem:[%s1532_s4] ss:$0 sm:$0xff]  ;;  %v984_v23 = vld [vmem:[%s1535_s7 + $0x18] sm:$0xf0] }
  0x27   : > { %568 = vmatpush.bf16.msra.mxu2 %v1061_v16  ;;  %v995_v12 = vor.u32 %v1074_v9, %v992_v10  ;;  %v976_v29 = vld [vmem:[%s1535_s7 + $0x8] sm:$0xf0] }
  0x28   : > { %626 = vmatpush.bf16.msra.mxu3 %v1066_v40 }
  0x29   : > { %473 = vmatpush.bf16.msra.mxu0 %v1044_v14 }
  0x2a   : > { %486 = vmatpush.bf16.msra.mxu1 %v1052_v15 }
  0x2b   : > { %569 = vmatpush.bf16.msra.mxu2 %v1060_v19  ;;  %v982_v19 = vld [vmem:[%s1535_s7 + $0x10] sm:$0xf] }
  0x2c   : > { %736 = vmatpush.bf16.msrb.mxu3 %v1031_v44 }
  0x2d   : > { %474 = vmatpush.bf16.msra.mxu0 %v1043_v17 }
  0x2e   : > { %487 = vmatpush.bf16.msra.mxu1 %v1051_v18 }
  0x2f   : > { %570 = vmatpush.bf16.msra.mxu2 %v1059_v26  ;;  %v1071_v26 = vld [vmem:[%s1535_s7 + $0x4] sm:$0xf0] }
  0x30   : > { %737 = vmatpush.bf16.msrb.mxu3 %v1023_v51 }
  0x31   : > { %475 = vmatpush.bf16.msra.mxu0 %v1042_v20  ;;  %v1073_v20 = vld [vmem:[%s1535_s7 + $0x14] sm:$0xf0] }
  0x32   : > { %488 = vmatpush.bf16.msra.mxu1 %v1050_v21  ;;  %v1072_v21 = vld [vmem:[%s1535_s7 + $0x14] sm:$0xf]  ;;  %v983_v22 = vor.u32 %v1073_v20, %v982_v19 }
  0x33   : > { %571 = vmatpush.bf16.msra.mxu2 %v1058_v27  ;;  %v1070_v27 = vld [vmem:[%s1535_s7 + $0x4] sm:$0xf] }
  0x34   : > { %476 = vmatmul.bf16.vlgmr.msra.gmra.mxu0 %v334_v24  ;;  %738 = vmatpush.bf16.msrb.mxu3 %v1015_v57  ;;  %v987_v24 = vor.u32 %v1072_v21, %v984_v23 }
  0x35   : > { %489 = vmatmul.bf16.vlgmr.msra.gmra.mxu1 %v335_v25  ;;  %749 = vmatpush.bf16.msrb.mxu0 %v1035_v48  ;;  %v974_v25 = vld [vmem:[%s1535_s7] sm:$0xf] }
  0x36   : > { %v975_v28 = vor.u32 %v1071_v26, %v974_v25 }
  0x38   : > { %739 = vmatpush.bf16.msrb.mxu3 %v1007_v63 }
  0x39   : > { %750 = vmatpush.bf16.msrb.mxu0 %v1027_v52 }
  0x3c   : > { %740 = vmatpush.bf16.msrb.mxu3 %v999_v5 }
  0x3d   : > { %751 = vmatpush.bf16.msrb.mxu0 %v1019_v58 }
  0x40   : > { %741 = vmatpush.bf16.msrb.mxu3 %v991_v11 }
  0x41   : > { %752 = vmatpush.bf16.msrb.mxu0 %v1011_v0 }
  0x44   : > { %742 = vmatpush.bf16.msrb.mxu3 %v983_v22 }
  0x45   : > { %753 = vmatpush.bf16.msrb.mxu0 %v1003_v6 }
  0x48   : > { %743 = vmatpush.bf16.msrb.mxu3 %v975_v28 }
  0x49   : > { %754 = vmatpush.bf16.msrb.mxu0 %v995_v12 }
  0x4d   : > { %755 = vmatpush.bf16.msrb.mxu0 %v987_v24 }
  0xb1   : > { %v477_v31 = vpop.f32.mrf.mxu0 }
  0xb2   : > { %v490_v32 = vpop.f32.mrf.mxu1  ;;  %v478_v33 = vadd.f32 %v1126_v30, %v477_v31  ;;  %v979_v30 = vor.u32 %v1070_v27, %v976_v29  ;;  %v1128_v31 = vld [vmem:[%s1534_s6] ss:$0 sm:$0xff] }
  0xb4   : > { %v491_v34 = vadd.f32 %v490_v32, %v478_v33  ;;  %756 = vmatpush.bf16.msrb.mxu0 %v979_v30 }
  0xb6   : > { %v494_v35 = vmax.f32 %v491_v34, 0.0 }
  0xb8   : > { %v495_v36 = vpack.c.bf16 %v494_v35, %v494_v35 }
  0xb9   : > { %v479_v37 = vpop.f32.mrf.mxu0 }
  0xba   : > { %v492_v38 = vpop.f32.mrf.mxu1  ;;  %572 = vmatmul.bf16.vlgmr.msra.gmra.mxu2 %v495_v36  ;;  %v650_v37 = vld [vmem:[%s1536_s8] sm:$0x3] }
  0xbb   : > { %v653_v38 = vperm.slane %v650_v37, 1  ;;  %v652_v42 = vperm.slane %v650_v37, 0 }
 0x13d   : > { %v573_v14 = vpop.f32.mrf.mxu2 }
 0x13e   : > { %v574_v15 = vadd.f32 %v1127_v13, %v573_v14 }
 0x140   : > { %v577_v16 = vmax.f32 %v574_v15, 0.0 }
 0x142   : > { %v578_v17 = vpack.c.bf16 %v577_v16, %v577_v16 }
 0x144   : > { %971 = vmatmul.msk.bf16.vlgmr.msra.gmra.mxu3 %vm615_vm0, %v578_v17 }
 0x145   : > { %v575_v18 = vpop.f32.mrf.mxu2 }
 0x1c7   : > { %v628_v32 = vpop.f32.mrf.mxu3 }
 0x1c8   : > { %v629_v33 = vadd.f32 %v1128_v31, %v628_v32 }
 0x1ca   : > { %v632_v34 = vmax.f32 %v629_v33, 0.0 }
 0x1cc   : > { %v633_v35 = vpack.c.bf16 %v632_v34, %v632_v34 }
 0x1ce   : > { %744 = vmatmul.bf16.vlgmr.msrb.gmra.mxu3 %v633_v35  ;;  %757 = vmatmul.bf16.vlgmr.msrb.gmra.mxu0 %v633_v35 }
 0x1cf   : > { %v630_v36 = vpop.f32.mrf.mxu3 }
 0x24b   : > { %v758_v39 = vpop.f32.mrf.mxu0 }
 0x24c   : > { %v759_v40 = vadd.f32 %v758_v39, %v653_v38 }
 0x24e   : > { %v763_v41 = vmax.f32 %v759_v40, -30.0 }
 0x250   : > { %v765_v43 = vsub.f32 0.0, %v763_v41 }
 0x251   : > { %v745_v44 = vpop.f32.mrf.mxu3 }
 0x252   : > { %v768_v45 = vmul.f32 1.442695, %v765_v43  ;;  %v746_v46 = vadd.f32 %v745_v44, %v652_v42 }
 0x253   : > { %v760_v47 = vpop.f32.mrf.mxu0 }
 0x254   : > { %1129 = vpow2.f32 %v768_v45  ;;  %v762_v48 = vmax.f32 %v746_v46, -30.0 }
 0x256   : > { %v764_v49 = vsub.f32 0.0, %v762_v48 }
 0x258   : > { %v766_v50 = vmul.f32 1.442695, %v764_v49 }
 0x259   : > { %v747_v51 = vpop.f32.mrf.mxu3 }
 0x25a   : > { %v1130_v52 = vpop.eup %1129  ;;  %1131 = vpow2.f32 %v766_v50 }
 0x25b   : > { %v771_v53 = vadd.f32 1.0, %v1130_v52 }
 0x25d   : > { %1133 = vrcp.f32 %v771_v53 }
 0x260   : > { %v1132_v54 = vpop.eup %1131 }
 0x261   : > { %v770_v55 = vadd.f32 1.0, %v1132_v54 }
 0x263   : > { %v1134_v56 = vpop.eup %1133  ;;  %1135 = vrcp.f32 %v770_v55 }
 0x264   : > { %775 = vst [vmem:[%s325_s21 + $0x8] sm:$0xff] %v1134_v56 }
 0x269   : > { %v1136_v57 = vpop.eup %1135 }
 0x26a   : > { %774 = vst [vmem:[%s325_s21] sm:$0xff] %v1136_v57 }
 0x26b   : > { %1164 = shalt.err (!%p1161_p3)
}
 0x26c   : > { %1087 = dma.vmem_to_hbm [thread:$0]  (%p1289_p5), %s791_s18, 256, %s793_s17, %s777_s22  }
 0x26d PF: > { %p1093_p4 = scmp.ge.s32.totalorder %s1199_s12, 2  ;;  %s804_s27 = sand.u32 1, %s1187_s30  }
 0x26e   : > { %s805_s14 = scalar_lea.sflag [#allocation3], %s804_s27 }
 0x26f   : > { %p1090_p7 = pnand %p1093_p4, %p1293_p6 }
 0x271   : > { %p1091_p8 = pneg %p1090_p7 }
 0x273   : > { %1182 = dma.done.wait (%p1091_p8), %s805_s14, 256  }
 0x274   : > { %1184 = vsyncadd (%p1091_p8), %s805_s14, 4294967040  ;;  %s1541_s16 = sld [smem:[#allocation5_spill]]  ;;  %p19_p9 = scmp.ge.s32.totalorder %s1276_s15, 4  }
 0x275   : > { %s1542_s30 = smov %s1191_s10  ;;  %s1543_s10 = smov %s1195_s11 }
 0x276   : > { %s1545_s12 = smov %s1276_s15  ;;  %21 = sbr.rel (!%p19_p9) target bundleno = 3 (0x3), region = 91 }
 0x27a   : > { %s1544_s11 = smov %s1541_s16 }
 0x27b   :  { %811 = vsyncpa [#allocation3], 1 }
 0x27c   :  { %813 = vsyncpa [#allocation3 + $0x1], 1 }

</bundles_post_ra>
